<compile_context>
chip_gen: v6e
topology: v6e:2x2x1
jax: 0.10.0
libtpu: 0.0.40
codegen_flags: <defaults>
</compile_context>

<pallas_src>
import math

import jax
import jax.numpy as jnp
from jax.experimental import pallas as pl
from jax.experimental.pallas import tpu as pltpu


def _ffn_kernel(x_ref, w1_ref, b1_ref, w2_ref, b2_ref, o_ref, acc_ref):
    # x_ref : (TM, d_model)      w1_ref: (d_model, TK)   b1_ref: (1, d_ff) full
    # w2_ref: (TK, d_out)        b2_ref: (1, d_out)
    # o_ref : (TM, d_out)        acc_ref: (TM, d_out) f32 scratch
    k = pl.program_id(1)
    tk = w1_ref.shape[1]

    @pl.when(k == 0)
    def _init():
        acc_ref[...] = jnp.zeros_like(acc_ref)

    # b1 is resident as a full (1, d_ff) block; slice the current d_ff chunk
    # in-kernel (avoids d_ff/tk tiny 1xTK DMAs per row block).
    start = k * tk
    if tk % 128 == 0:
        start = pl.multiple_of(start, 128)
    b1 = b1_ref[:, pl.ds(start, tk)]

    # h_chunk = relu(x @ W1[:, chunk] + b1[chunk])   (f32 accumulate on MXU)
    h = jnp.dot(x_ref[...], w1_ref[...], preferred_element_type=jnp.float32)
    h = jnp.maximum(h + b1.astype(jnp.float32), 0.0)

    # acc += h_chunk @ W2[chunk, :]
    # Note: for bf16 operands h is cast back to bf16 for the second matmul
    # (intended fast path; slightly lower precision than a torch f32 ref).
    acc_ref[...] += jnp.dot(h.astype(w2_ref.dtype), w2_ref[...],
                            preferred_element_type=jnp.float32)

    @pl.when(k == pl.num_programs(1) - 1)
    def _finalize():
        # TODO(synk): training-mode dropout (stochastic mask via
        # pltpu.prng_seed / prng_random_bits) not implemented; forward matches
        # eval()/inference semantics (identity).
        o_ref[...] = (acc_ref[...] + b2_ref[...].astype(jnp.float32)
                      ).astype(o_ref.dtype)


def _round_up(x, m):
    return -(-x // m) * m


def _round_down(x, m):
    return (x // m) * m


def _tpu_defaults():
    """Per-generation tiling defaults.

    Returns (mxu_align, target_tm, target_tk, vmem_budget_bytes, two_cores).
    """
    try:
        kind = jax.devices()[0].device_kind.lower()
    except Exception:
        kind = ""
    try:
        vmem_cap = int(pltpu.get_tpu_info().vmem_capacity_bytes)
    except Exception:
        vmem_cap = None

    is_v7 = "v7" in kind
    is_v5e = ("v5e" in kind) or ("v5 lite" in kind) or ("v5lite" in kind)

    if vmem_cap is None:
        if is_v5e or ("v6" in kind) or ("v5p" in kind) or ("v4" in kind):
            vmem_cap = 128 << 20
        else:
            vmem_cap = 64 << 20        # conservative (v7x is 64 MiB per TC)
    if is_v7:
        vmem_cap = min(vmem_cap, 64 << 20)   # per-TensorCore on v7x

    mxu_align = 128 if is_v5e else 256       # MXU M-tile height
    if is_v7:
        target_tm = 512    # ~310 FLOPs/byte needed (996 TF/s / 3.2 TB/s)
    elif is_v5e:
        target_tm = 384    # ~240 FLOPs/byte needed (197 TF/s / 0.82 TB/s)
    else:
        target_tm = 768    # v6e: ~640 FLOPs/byte needed (918 TF/s / 1.4 TB/s)

    target_tk = 2048 if vmem_cap >= (96 << 20) else 1024
    vmem_budget = max(vmem_cap - (16 << 20), 24 << 20)
    return mxu_align, target_tm, target_tk, vmem_budget, is_v7


def _pick_ff_tile(d_ff, max_tile):
    """d_ff chunk that divides d_ff exactly and is a multiple of 128 lanes
    (or is the whole d_ff when d_ff is small / not 128-aligned)."""
    if d_ff <= max_tile or d_ff % 128 != 0:
        return d_ff
    t = (max_tile // 128) * 128
    while t >= 128:
        if d_ff % t == 0:
            return t
        t -= 128
    return d_ff


def _vmem_estimate(tm, tk, d_model, d_ff, d_out, itemsize):
    """Double-buffered in/out blocks + resident f32 accumulator."""
    dbuf = 2 * itemsize * (tm * d_model      # x block
                           + d_model * tk    # W1 chunk
                           + d_ff            # b1 (full, constant index)
                           + tk * d_out      # W2 chunk
                           + d_out           # b2
                           + tm * d_out)     # out block
    return dbuf + 4 * tm * d_out             # f32 accumulator scratch


def positionwise_ffn(x, w1, b1, w2, b2, *, row_tile=None, ff_tile=None,
                     use_bf16=False, vmem_limit_bytes=None):
    """y = relu(x @ w1 + b1) @ w2 + b2 for x of shape (..., d_model).

    w1: (d_model, d_ff), w2: (d_ff, d_out) — already transposed vs. torch.
    Compute dtype follows the inputs; with use_bf16=True an f32 caller gets
    bf16 operands on the MXU (output stays f32).  The in-kernel accumulator
    is always float32.
    """
    orig_shape = x.shape
    out_dtype = x.dtype
    d_model = orig_shape[-1]
    d_ff = w1.shape[1]
    d_out = w2.shape[1]

    if use_bf16 and x.dtype == jnp.float32:
        # Fast MXU path: bf16 operands, f32 accumulation, f32 output.
        x = x.astype(jnp.bfloat16)
        w1 = w1.astype(jnp.bfloat16)
        b1 = b1.astype(jnp.bfloat16)
        w2 = w2.astype(jnp.bfloat16)
        b2 = b2.astype(jnp.bfloat16)

    x2d = x.reshape(-1, d_model)
    n_rows = x2d.shape[0]
    itemsize = jnp.dtype(x2d.dtype).itemsize

    mxu_align, target_tm, target_tk, vmem_budget, two_cores = _tpu_defaults()
    if row_tile is not None:
        target_tm = row_tile
    if ff_tile is not None:
        target_tk = ff_tile

    # ---- row tile (M): MXU-aligned, large enough to be MXU-bound ----------
    if n_rows <= 8:
        tm = max(n_rows, 1)                  # block == full dim (allowed)
    else:
        tm = min(target_tm, n_rows)
        if tm >= mxu_align:
            tm = _round_down(tm, mxu_align)  # keep MXU rows fully utilized
        else:
            tm = max(8, _round_down(tm, 8))
        if two_cores and n_rows > mxu_align:
            # v7x: keep >= 2 row blocks so both TensorCores get work.
            tm = min(tm, _round_up(-(-n_rows // 2), mxu_align))

    # ---- d_ff (reduction) tile (K) — VMEM working set independent of d_ff --
    tk = _pick_ff_tile(d_ff, max(128, target_tk))

    # ---- enforce the VMEM budget by shrinking tiles (tk first, then tm) ----
    while _vmem_estimate(tm, tk, d_model, d_ff, d_out, itemsize) > vmem_budget:
        if tk > 128 and d_ff % 128 == 0:
            new_tk = _pick_ff_tile(d_ff, max(128, tk // 2))
            if new_tk < tk:
                tk = new_tk
                continue
        if tm > mxu_align:
            tm = max(mxu_align, _round_down(tm // 2, mxu_align))
            continue
        if tm > 8:
            tm = max(8, _round_down(tm // 2, 8))
            continue
        break  # smallest feasible tiles; rely on the limit / Mosaic

    grid = (pl.cdiv(n_rows, tm), d_ff // tk)
    n_row_blocks = grid[0]

    b1_2d = b1.reshape(1, d_ff)
    b2_2d = b2.reshape(1, d_out)

    est = _vmem_estimate(tm, tk, d_model, d_ff, d_out, itemsize)
    if vmem_limit_bytes is None:
        vmem_limit_bytes = int(min(vmem_budget + (8 << 20),
                                   max(est + (12 << 20), 32 << 20)))

    flops = 2 * n_rows * d_model * d_ff + 2 * n_rows * d_ff * d_out
    # Weights/biases are re-streamed from HBM once per row block (k innermost).
    bytes_accessed = itemsize * (n_rows * d_model + n_rows * d_out
                                 + n_row_blocks * (d_model * d_ff + d_ff
                                                   + d_ff * d_out + d_out))

    out = pl.pallas_call(
        _ffn_kernel,
        out_shape=jax.ShapeDtypeStruct((n_rows, d_out), out_dtype),
        grid_spec=pltpu.PrefetchScalarGridSpec(
            num_scalar_prefetch=0,
            grid=grid,
            in_specs=[
                pl.BlockSpec((tm, d_model), lambda i, k: (i, 0)),
                pl.BlockSpec((d_model, tk), lambda i, k: (0, k)),
                pl.BlockSpec((1, d_ff), lambda i, k: (0, 0)),
                pl.BlockSpec((tk, d_out), lambda i, k: (k, 0)),
                pl.BlockSpec((1, d_out), lambda i, k: (0, 0)),
            ],
            out_specs=pl.BlockSpec((tm, d_out), lambda i, k: (i, 0)),
            scratch_shapes=[pltpu.VMEM((tm, d_out), jnp.float32)],
        ),
        compiler_params=pltpu.CompilerParams(
            dimension_semantics=("parallel", "arbitrary"),
            vmem_limit_bytes=vmem_limit_bytes,
        ),
        cost_estimate=pl.CostEstimate(
            flops=flops, transcendentals=0, bytes_accessed=bytes_accessed),
    )(x2d, w1, b1_2d, w2, b2_2d)

    return out.reshape(*orig_shape[:-1], d_out)


def init_ffn_params(key, d_model, d_ff, d_out, dtype=jnp.float32):
    """nn.Linear-style init (uniform +/- 1/sqrt(fan_in)); weights stored
    already transposed for x @ W."""
    k1, k2, k3, k4 = jax.random.split(key, 4)
    bound1 = 1.0 / math.sqrt(d_model)
    bound2 = 1.0 / math.sqrt(d_ff)
    w1 = jax.random.uniform(k1, (d_model, d_ff), dtype, -bound1, bound1)
    b1 = jax.random.uniform(k2, (d_ff,), dtype, -bound1, bound1)
    w2 = jax.random.uniform(k3, (d_ff, d_out), dtype, -bound2, bound2)
    b2 = jax.random.uniform(k4, (d_out,), dtype, -bound2, bound2)
    return w1, b1, w2, b2


def _ref_ffn(x, w1, b1, w2, b2):
    return jnp.maximum(x @ w1 + b1, 0.0) @ w2 + b2


if __name__ == "__main__":
    batch, seq = 2, 8
    d_model, d_ff, d_out = 128, 256, 128   # lane-dense (multiples of 128)

    key = jax.random.PRNGKey(0)
    kx, kp = jax.random.split(key)
    x = jax.random.normal(kx, (batch, seq, d_model), dtype=jnp.float32)
    w1, b1, w2, b2 = init_ffn_params(kp, d_model, d_ff, d_out)
    ref = _ref_ffn(x, w1, b1, w2, b2)

    # 1) f32, auto tiles (single d_ff chunk at this size)
    y = jax.block_until_ready(positionwise_ffn(x, w1, b1, w2, b2))
    assert y.shape == (batch, seq, d_out)
    assert jnp.allclose(y, ref, atol=1e-4, rtol=1e-4)

    # 2) f32, K-tiled over d_ff (exercises accumulator + in-kernel b1 slicing)
    y2 = jax.block_until_ready(positionwise_ffn(x, w1, b1, w2, b2, ff_tile=128))
    assert jnp.allclose(y2, ref, atol=1e-4, rtol=1e-4)

    # 3) ragged row count (last row block masked by Pallas, no padding copy)
    xr = jax.random.normal(kx, (batch, seq + 1, d_model), dtype=jnp.float32)
    yr = jax.block_until_ready(positionwise_ffn(xr, w1, b1, w2, b2, ff_tile=128))
    assert jnp.allclose(yr, _ref_ffn(xr, w1, b1, w2, b2), atol=1e-4, rtol=1e-4)

    # 4) bf16 operands (fast MXU path), f32 accumulation inside the kernel
    xb = x.astype(jnp.bfloat16)
    yb = jax.block_until_ready(positionwise_ffn(
        xb, w1.astype(jnp.bfloat16), b1.astype(jnp.bfloat16),
        w2.astype(jnp.bfloat16), b2.astype(jnp.bfloat16), ff_tile=128))
    assert jnp.allclose(yb.astype(jnp.float32), ref, atol=5e-2, rtol=5e-2)

    # 5) f32 caller with in-wrapper bf16 cast (use_bf16=True); output stays f32
    y5 = jax.block_until_ready(positionwise_ffn(x, w1, b1, w2, b2, use_bf16=True))
    assert y5.dtype == x.dtype
    assert jnp.allclose(y5, ref, atol=5e-2, rtol=5e-2)

    print("KERNEL_OK")
</pallas_src>

<mosaic_0001>
module attributes {stable_mosaic.version = 11 : i64} {
  func.func @_ffn_kernel(%arg0: i32, %arg1: i32, %arg2: memref<16x128xf32, #tpu.memory_space<vmem>>, %arg3: memref<128x256xf32, #tpu.memory_space<vmem>>, %arg4: memref<1x256xf32, #tpu.memory_space<vmem>>, %arg5: memref<256x128xf32, #tpu.memory_space<vmem>>, %arg6: memref<1x128xf32, #tpu.memory_space<vmem>>, %arg7: memref<16x128xf32, #tpu.memory_space<vmem>>, %arg8: memref<16x128xf32, #tpu.memory_space<vmem>>) attributes {dimension_semantics = [#tpu.dimension_semantics<parallel>, #tpu.dimension_semantics<arbitrary>], iteration_bounds = array<i64: 1, 1>, scalar_prefetch = 0 : i64, scratch_operands = 1 : i64, tpu.core_type = #tpu.core_type<tc>, window_params = [{transform_indices = @transform_0, window_bounds = array<i64: 16, 128>}, {transform_indices = @transform_1, window_bounds = array<i64: 128, 256>}, {pipeline_mode = #tpu.pipeline_mode<synchronous>, transform_indices = @transform_2, window_bounds = array<i64: 1, 256>}, {transform_indices = @transform_3, window_bounds = array<i64: 256, 128>}, {pipeline_mode = #tpu.pipeline_mode<synchronous>, transform_indices = @transform_4, window_bounds = array<i64: 1, 128>}, {transform_indices = @transform_5, window_bounds = array<i64: 16, 128>}]} {
    %c0_i32 = arith.constant 0 : i32
    %0 = arith.cmpi eq, %arg1, %c0_i32 : i32
    %1 = arith.extui %0 : i1 to i32
    %c0_i32_0 = arith.constant 0 : i32
    %2 = arith.cmpi ne, %1, %c0_i32_0 : i32
    scf.if %2 {
      %cst_15 = arith.constant 0.000000e+00 : f32
      %22 = vector.broadcast %cst_15 : f32 to vector<16x128xf32>
      %c0_16 = arith.constant 0 : index
      %c0_17 = arith.constant 0 : index
      %23 = vector.load %arg8[%c0_16, %c0_17] : memref<16x128xf32, #tpu.memory_space<vmem>>, vector<16x128xf32>
      tpu.vector_store %arg8[%c0_16, %c0_17], %22 {strides = array<i32>} : memref<16x128xf32, #tpu.memory_space<vmem>>, vector<16x128xf32>,
    } else {
    }
    %c256_i32 = arith.constant 256 : i32
    %3 = arith.muli %arg1, %c256_i32 : i32
    %4 = tpu.assume_multiple %3, 128 : i32
    %c0 = arith.constant 0 : index
    %5 = arith.index_cast %4 : i32 to index
    %6 = vector.load %arg4[%c0, %5] : memref<1x256xf32, #tpu.memory_space<vmem>>, vector<1x256xf32>
    %c0_1 = arith.constant 0 : index
    %c0_2 = arith.constant 0 : index
    %7 = vector.load %arg2[%c0_1, %c0_2] : memref<16x128xf32, #tpu.memory_space<vmem>>, vector<16x128xf32>
    %c0_3 = arith.constant 0 : index
    %c0_4 = arith.constant 0 : index
    %8 = vector.load %arg3[%c0_3, %c0_4] : memref<128x256xf32, #tpu.memory_space<vmem>>, vector<128x256xf32>
    %cst = arith.constant dense<0.000000e+00> : vector<16x256xf32>
    %9 = tpu.matmul %7, %8, %cst {dimension_numbers = #tpu.dot_dimension_numbers<[1], [0], [0], [1], [0, 0, 1, 1], [], []>} : vector<16x128xf32>, vector<128x256xf32>, vector<16x256xf32> -> vector<16x256xf32>
    %10 = vector.broadcast %6 : vector<1x256xf32> to vector<16x256xf32>
    %11 = arith.addf %9, %10 : vector<16x256xf32>
    %cst_5 = arith.constant 0.000000e+00 : f32
    %12 = vector.broadcast %cst_5 : f32 to vector<16x256xf32>
    %13 = arith.maximumf %11, %12 : vector<16x256xf32>
    %c0_6 = arith.constant 0 : index
    %c0_7 = arith.constant 0 : index
    %14 = vector.load %arg8[%c0_6, %c0_7] : memref<16x128xf32, #tpu.memory_space<vmem>>, vector<16x128xf32>
    %c0_8 = arith.constant 0 : index
    %c0_9 = arith.constant 0 : index
    %15 = vector.load %arg5[%c0_8, %c0_9] : memref<256x128xf32, #tpu.memory_space<vmem>>, vector<256x128xf32>
    %cst_10 = arith.constant dense<0.000000e+00> : vector<16x128xf32>
    %16 = tpu.matmul %13, %15, %cst_10 {dimension_numbers = #tpu.dot_dimension_numbers<[1], [0], [0], [1], [0, 0, 1, 1], [], []>} : vector<16x256xf32>, vector<256x128xf32>, vector<16x128xf32> -> vector<16x128xf32>
    %17 = arith.addf %14, %16 : vector<16x128xf32>
    %c0_11 = arith.constant 0 : index
    %c0_12 = arith.constant 0 : index
    %18 = vector.load %arg8[%c0_11, %c0_12] : memref<16x128xf32, #tpu.memory_space<vmem>>, vector<16x128xf32>
    tpu.vector_store %arg8[%c0_11, %c0_12], %17 {strides = array<i32>} : memref<16x128xf32, #tpu.memory_space<vmem>>, vector<16x128xf32>,
    %c0_i32_13 = arith.constant 0 : i32
    %19 = arith.cmpi eq, %arg1, %c0_i32_13 : i32
    %20 = arith.extui %19 : i1 to i32
    %c0_i32_14 = arith.constant 0 : i32
    %21 = arith.cmpi ne, %20, %c0_i32_14 : i32
    scf.if %21 {
      %c0_15 = arith.constant 0 : index
      %c0_16 = arith.constant 0 : index
      %22 = vector.load %arg8[%c0_15, %c0_16] : memref<16x128xf32, #tpu.memory_space<vmem>>, vector<16x128xf32>
      %c0_17 = arith.constant 0 : index
      %c0_18 = arith.constant 0 : index
      %23 = vector.load %arg6[%c0_17, %c0_18] : memref<1x128xf32, #tpu.memory_space<vmem>>, vector<1x128xf32>
      %24 = vector.broadcast %23 : vector<1x128xf32> to vector<16x128xf32>
      %25 = arith.addf %22, %24 : vector<16x128xf32>
      %c0_19 = arith.constant 0 : index
      %c0_20 = arith.constant 0 : index
      %26 = vector.load %arg7[%c0_19, %c0_20] : memref<16x128xf32, #tpu.memory_space<vmem>>, vector<16x128xf32>
      tpu.vector_store %arg7[%c0_19, %c0_20], %25 {strides = array<i32>} : memref<16x128xf32, #tpu.memory_space<vmem>>, vector<16x128xf32>,
    } else {
    }
    return
  }
  func.func @transform_0(%arg0: i32, %arg1: i32) -> (i32, i32) {
    %c0_i32 = arith.constant 0 : i32
    %c0_i32_0 = arith.constant 0 : i32
    return %arg0, %c0_i32 : i32, i32
  }
  func.func @transform_1(%arg0: i32, %arg1: i32) -> (i32, i32) {
    %c0_i32 = arith.constant 0 : i32
    %c0_i32_0 = arith.constant 0 : i32
    return %c0_i32, %arg1 : i32, i32
  }
  func.func @transform_2(%arg0: i32, %arg1: i32) -> (i32, i32) {
    %c0_i32 = arith.constant 0 : i32
    %c0_i32_0 = arith.constant 0 : i32
    %c0_i32_1 = arith.constant 0 : i32
    return %c0_i32, %c0_i32_0 : i32, i32
  }
  func.func @transform_3(%arg0: i32, %arg1: i32) -> (i32, i32) {
    %c0_i32 = arith.constant 0 : i32
    %c0_i32_0 = arith.constant 0 : i32
    return %arg1, %c0_i32 : i32, i32
  }
  func.func @transform_4(%arg0: i32, %arg1: i32) -> (i32, i32) {
    %c0_i32 = arith.constant 0 : i32
    %c0_i32_0 = arith.constant 0 : i32
    %c0_i32_1 = arith.constant 0 : i32
    return %c0_i32, %c0_i32_0 : i32, i32
  }
  func.func @transform_5(%arg0: i32, %arg1: i32) -> (i32, i32) {
    %c0_i32 = arith.constant 0 : i32
    %c0_i32_0 = arith.constant 0 : i32
    return %arg0, %c0_i32 : i32, i32
  }
}

</mosaic_0001>

<bundles_post_ra>
// kernel: tpu_custom_call.1
= control target key start
LH: loop header
LB: loop body
LE: loop exit
PB: predicated region body
PF: predicated region fallthrough
CT: control target
= control target key end

     0   :  { %10 = vsyncpa [#allocation4], 0  ;;  %s549_s0 = inlined_call_operand.hbm [shape: f32[16,128], index: 0, kind: input, shape index: {}]   ;;  %s550_s1 = inlined_call_operand.hbm [shape: f32[128,256], index: 1, kind: input, shape index: {}]   ;;  %s551_s2 = inlined_call_operand.vmem [shape: f32[1,256], index: 2, kind: input, shape index: {}]   ;;  %s552_s3 = inlined_call_operand.hbm [shape: f32[256,128], index: 3, kind: input, shape index: {}]   ;;  %s553_s4 = inlined_call_operand.vmem [shape: f32[1,128], index: 4, kind: input, shape index: {}]   ;;  %s554_s5 = inlined_call_operand.hbm [shape: f32[16,128], index: 5, kind: output, shape index: {}]  }
   0x1   :  { %11 = vsyncpa [#allocation7], 0 }
   0x2   :  { %12 = vsyncpa [#allocation5], 0  ;;  %s481_s18 = smov [#allocation6]  }
   0x3   :  { %s30_s19 = sshll.u32 %s481_s18, 4  ;;  %s31_s19 = int_to_ptr.vmem [resolvable:$true] %s30_s19 }
   0x4   :  { %s403_s20 = scalar_lea.vmem %s31_s19, 4096  ;;  %p408_p1 = scmp.lt.s32.totalorder %s31_s19, %s31_s19 }
   0x5   :  { %p404_p0 = scmp.ne.s32.totalorder %s31_s19, %s403_s20  ;;  %p409_p2 = scmp.lt.s32.totalorder %s403_s20, %s403_s20 }
   0x7   :  { %p410_p3 = por %p409_p2, %p408_p1 }
   0x9   :  { %p411_p4 = pnand %p410_p3, %p404_p0 }
   0xb   :  { %414 = shalt.err (!%p411_p4)
}
   0xc   :  { %s482_s21 = smov 256   ;;  %s483_s22 = smov 16  }
   0xd   :  { %36 = dma.hbm_to_vmem [thread:$0]  %s550_s1, 4096, %s31_s19, [#allocation7], %s482_s21, %s482_s21, %s483_s22  }
   0xe   :  { %s484_s25 = smov [#allocation3]  }
   0xf   :  { %s18_s26 = sshll.u32 %s484_s25, 4  ;;  %s19_s26 = int_to_ptr.vmem [resolvable:$true] %s18_s26 }
  0x10   :  { %s423_s27 = scalar_lea.vmem %s19_s26, 256  ;;  %p428_p6 = scmp.lt.s32.totalorder %s19_s26, %s19_s26 }
  0x11   :  { %p424_p5 = scmp.ne.s32.totalorder %s19_s26, %s423_s27  ;;  %p429_p7 = scmp.lt.s32.totalorder %s423_s27, %s423_s27 }
  0x13   :  { %p430_p8 = por %p429_p7, %p428_p6 }
  0x15   :  { %p431_p9 = pnand %p430_p8, %p424_p5 }
  0x17   :  { %434 = shalt.err (!%p431_p9)
}
  0x18   :  { %s485_s28 = smov 128   ;;  %s486_s29 = smov 8  }
  0x19   :  { %24 = dma.hbm_to_vmem [thread:$0]  %s549_s0, 256, %s19_s26, [#allocation4], %s485_s28, %s485_s28, %s486_s29  }
  0x1a   :  { %s487_s1 = smov [#allocation8]  }
  0x1b   :  { %s44_s7 = sshll.u32 %s487_s1, 4  ;;  %s45_s7 = int_to_ptr.vmem [resolvable:$true] %s44_s7 }
  0x1c   :  { %s443_s8 = scalar_lea.vmem %s45_s7, 4096  ;;  %p448_p11 = scmp.lt.s32.totalorder %s45_s7, %s45_s7 }
  0x1d   :  { %p444_p10 = scmp.ne.s32.totalorder %s45_s7, %s443_s8  ;;  %p449_p12 = scmp.lt.s32.totalorder %s443_s8, %s443_s8 }
  0x1f   :  { %p450_p13 = por %p449_p12, %p448_p11 }
  0x21   :  { %p451_p0 = pnand %p450_p13, %p444_p10 }
  0x23   :  { %454 = shalt.err (!%p451_p0)
}
  0x24   :  { %50 = dma.hbm_to_vmem [thread:$0]  %s552_s3, 4096, %s45_s7, [#allocation7], %s485_s28, %s485_s28, %s486_s29  }
  0x25   :  { %475 = dma.done.wait [#allocation4], 256  }
  0x26   :  { %476 = vsyncadd [#allocation4], 4294967040 }
  0x27   :  { %477 = dma.done.wait [#allocation7], 8192  }
  0x28   :  { %478 = vsyncadd [#allocation7], 4294959104  ;;  %v488_v0 = vmov 0.0   ;;  %v106_v1 = vld [vmem:[#allocation6 + $0xf8] sm:$0xff]  ;;  %v105_v2 = vld [vmem:[#allocation6 + $0xf0] sm:$0xff]  ;;  %s489_s12 = smov [#allocation9]  }
  0x29   :  { %182 = vmatprep.mubr.f32.mxu0 %v488_v0  ;;  %v104_v3 = vld [vmem:[#allocation6 + $0xe8] sm:$0xff]  ;;  %118 = vmatprep.subr.mxu0 %v106_v1  ;;  %v103_v4 = vld [vmem:[#allocation6 + $0xe0] sm:$0xff]  ;;  %v102_v5 = vld [vmem:[#allocation6 + $0xd8] sm:$0xff]  ;;  %s333_s13 = sshll.u32 %s489_s12, 4  ;;  %s334_s13 = int_to_ptr.vmem [resolvable:$true] %s333_s13 }
  0x2a   :  { %119 = vmatpush1.msra.mxu0 %v105_v2  ;;  %v101_v6 = vld [vmem:[#allocation6 + $0xd0] sm:$0xff]  ;;  %v100_v7 = vld [vmem:[#allocation6 + $0xc8] sm:$0xff]  ;;  %v99_v8 = vld [vmem:[#allocation6 + $0xc0] sm:$0xff]  ;;  %s455_s14 = scalar_lea.vmem %s334_s13, 256  ;;  %p460_p2 = scmp.lt.s32.totalorder %s334_s13, %s334_s13 }
  0x2b   :  { %120 = vmatprep.subr.mxu0 %v104_v3  ;;  %v98_v9 = vld [vmem:[#allocation6 + $0xb8] sm:$0xff]  ;;  %v97_v10 = vld [vmem:[#allocation6 + $0xb0] sm:$0xff]  ;;  %v96_v11 = vld [vmem:[#allocation6 + $0xa8] sm:$0xff]  ;;  %p456_p1 = scmp.ne.s32.totalorder %s334_s13, %s455_s14  ;;  %p461_p3 = scmp.lt.s32.totalorder %s455_s14, %s455_s14 }
  0x2c   :  { %121 = vmatpush1.msra.mxu0 %v103_v4  ;;  %v95_v12 = vld [vmem:[#allocation6 + $0xa0] sm:$0xff]  ;;  %v94_v13 = vld [vmem:[#allocation6 + $0x98] sm:$0xff]  ;;  %v93_v14 = vld [vmem:[#allocation6 + $0x90] sm:$0xff] }
  0x2d   :  { %122 = vmatprep.subr.mxu0 %v102_v5  ;;  %v232_v15 = vld [vmem:[#allocation8 + $0xf8] sm:$0xff]  ;;  %v92_v17 = vld [vmem:[#allocation6 + $0x88] sm:$0xff]  ;;  %v231_v18 = vld [vmem:[#allocation8 + $0xf0] sm:$0xff]  ;;  %p462_p4 = por %p461_p3, %p460_p2 }
  0x2e   :  { %123 = vmatpush1.msra.mxu0 %v101_v6  ;;  %v216_v16 = vld [vmem:[#allocation8 + $0x78] sm:$0xff]  ;;  %348 = vmatprep.subr.mxu1 %v232_v15  ;;  %v215_v19 = vld [vmem:[#allocation8 + $0x70] sm:$0xff]  ;;  %v91_v20 = vld [vmem:[#allocation6 + $0x80] sm:$0xff] }
  0x2f   :  { %124 = vmatprep.subr.mxu0 %v100_v7  ;;  %349 = vmatpush3.msra.mxu1 %v216_v16  ;;  %v230_v21 = vld [vmem:[#allocation8 + $0xe8] sm:$0xff]  ;;  %v90_v22 = vld [vmem:[#allocation6 + $0x78] sm:$0xff]  ;;  %v89_v24 = vld [vmem:[#allocation6 + $0x70] sm:$0xff]  ;;  %p463_p5 = pnand %p462_p4, %p456_p1 }
  0x30   :  { %125 = vmatpush1.msra.mxu0 %v99_v8  ;;  %350 = vmatprep.subr.mxu1 %v231_v18  ;;  %v214_v23 = vld [vmem:[#allocation8 + $0x68] sm:$0xff]  ;;  %v229_v25 = vld [vmem:[#allocation8 + $0xe0] sm:$0xff]  ;;  %v228_v29 = vld [vmem:[#allocation8 + $0xd8] sm:$0xff] }
  0x31   :  { %126 = vmatprep.subr.mxu0 %v98_v9  ;;  %351 = vmatpush3.msra.mxu1 %v215_v19  ;;  %v88_v26 = vld [vmem:[#allocation6 + $0x68] sm:$0xff]  ;;  %v213_v27 = vld [vmem:[#allocation8 + $0x60] sm:$0xff]  ;;  %v86_v30 = vld [vmem:[#allocation6 + $0x58] sm:$0xff] }
  0x32   :  { %127 = vmatpush1.msra.mxu0 %v97_v10  ;;  %352 = vmatprep.subr.mxu1 %v230_v21  ;;  %v87_v28 = vld [vmem:[#allocation6 + $0x60] sm:$0xff]  ;;  %v212_v31 = vld [vmem:[#allocation8 + $0x58] sm:$0xff]  ;;  %v85_v32 = vld [vmem:[#allocation6 + $0x50] sm:$0xff] }
  0x33   :  { %128 = vmatprep.subr.mxu0 %v96_v11  ;;  %353 = vmatpush3.msra.mxu1 %v214_v23  ;;  %v227_v33 = vld [vmem:[#allocation8 + $0xd0] sm:$0xff]  ;;  %v84_v34 = vld [vmem:[#allocation6 + $0x48] sm:$0xff]  ;;  %v83_v36 = vld [vmem:[#allocation6 + $0x40] sm:$0xff] }
  0x34   :  { %129 = vmatpush1.msra.mxu0 %v95_v12  ;;  %354 = vmatprep.subr.mxu1 %v229_v25  ;;  %v211_v35 = vld [vmem:[#allocation8 + $0x50] sm:$0xff]  ;;  %v226_v37 = vld [vmem:[#allocation8 + $0xc8] sm:$0xff]  ;;  %v82_v38 = vld [vmem:[#allocation6 + $0x38] sm:$0xff] }
  0x35   :  { %130 = vmatprep.subr.mxu0 %v94_v13  ;;  %355 = vmatpush3.msra.mxu1 %v213_v27  ;;  %v210_v39 = vld [vmem:[#allocation8 + $0x48] sm:$0xff]  ;;  %v81_v40 = vld [vmem:[#allocation6 + $0x30] sm:$0xff]  ;;  %v225_v41 = vld [vmem:[#allocation8 + $0xc0] sm:$0xff] }
  0x36   :  { %131 = vmatpush1.msra.mxu0 %v93_v14  ;;  %356 = vmatprep.subr.mxu1 %v228_v29  ;;  %v80_v42 = vld [vmem:[#allocation6 + $0x28] sm:$0xff]  ;;  %v209_v43 = vld [vmem:[#allocation8 + $0x40] sm:$0xff]  ;;  %v224_v45 = vld [vmem:[#allocation8 + $0xb8] sm:$0xff] }
  0x37   :  { %132 = vmatprep.subr.mxu0 %v92_v17  ;;  %357 = vmatpush3.msra.mxu1 %v212_v31  ;;  %v79_v44 = vld [vmem:[#allocation6 + $0x20] sm:$0xff]  ;;  %v78_v46 = vld [vmem:[#allocation6 + $0x18] sm:$0xff]  ;;  %v77_v48 = vld [vmem:[#allocation6 + $0x10] sm:$0xff] }
  0x38   :  { %133 = vmatpush1.msra.mxu0 %v91_v20  ;;  %358 = vmatprep.subr.mxu1 %v227_v33  ;;  %v208_v47 = vld [vmem:[#allocation8 + $0x38] sm:$0xff]  ;;  %v223_v49 = vld [vmem:[#allocation8 + $0xb0] sm:$0xff]  ;;  %v76_v50 = vld [vmem:[#allocation6 + $0x8] sm:$0xff] }
  0x39   :  { %134 = vmatprep.subr.mxu0 %v90_v22  ;;  %359 = vmatpush3.msra.mxu1 %v211_v35  ;;  %v207_v51 = vld [vmem:[#allocation8 + $0x30] sm:$0xff]  ;;  %v75_v52 = vld [vmem:[#allocation6] sm:$0xff]  ;;  %v222_v53 = vld [vmem:[#allocation8 + $0xa8] sm:$0xff] }
  0x3a   :  { %135 = vmatpush1.msra.mxu0 %v89_v24  ;;  %360 = vmatprep.subr.mxu1 %v226_v37  ;;  %v73_v54 = vld [vmem:[#allocation3] sm:$0xff]  ;;  %v206_v55 = vld [vmem:[#allocation8 + $0x28] sm:$0xff]  ;;  %v221_v56 = vld [vmem:[#allocation8 + $0xa0] sm:$0xff] }
  0x3b   :  { %136 = vmatprep.subr.mxu0 %v88_v26  ;;  %361 = vmatpush3.msra.mxu1 %v210_v39  ;;  %v205_v57 = vld [vmem:[#allocation8 + $0x20] sm:$0xff]  ;;  %v74_v58 = vld [vmem:[#allocation3 + $0x8] sm:$0xff]  ;;  %v219_v61 = vld [vmem:[#allocation8 + $0x90] sm:$0xff] }
  0x3c   :  { %137 = vmatpush1.msra.mxu0 %v87_v28  ;;  %362 = vmatprep.subr.mxu1 %v225_v41  ;;  %v220_v59 = vld [vmem:[#allocation8 + $0x98] sm:$0xff]  ;;  %v203_v62 = vld [vmem:[#allocation8 + $0x10] sm:$0xff]  ;;  %v218_v63 = vld [vmem:[#allocation8 + $0x88] sm:$0xff] }
  0x3d   :  { %138 = vmatprep.subr.mxu0 %v86_v30  ;;  %363 = vmatpush3.msra.mxu1 %v209_v43  ;;  %v204_v60 = vld [vmem:[#allocation8 + $0x18] sm:$0xff]  ;;  %v202_v1 = vld [vmem:[#allocation8 + $0x8] sm:$0xff]  ;;  %v217_v2 = vld [vmem:[#allocation8 + $0x80] sm:$0xff] }
  0x3e   :  { %139 = vmatpush1.msra.mxu0 %v85_v32  ;;  %364 = vmatprep.subr.mxu1 %v224_v45  ;;  %v201_v3 = vld [vmem:[#allocation8] sm:$0xff]  ;;  %v72_v6 = vld [vmem:[%s551_s2] sm:$0x3] }
  0x3f   :  { %140 = vmatprep.subr.mxu0 %v84_v34  ;;  %365 = vmatpush3.msra.mxu1 %v208_v47  ;;  %v347_v24 = vld [vmem:[%s553_s4] ss:$0 sm:$0xff] }
  0x40   :  { %141 = vmatpush1.msra.mxu0 %v83_v36  ;;  %366 = vmatprep.subr.mxu1 %v223_v49 }
  0x41   :  { %142 = vmatprep.subr.mxu0 %v82_v38  ;;  %367 = vmatpush3.msra.mxu1 %v207_v51 }
  0x42   :  { %143 = vmatpush1.msra.mxu0 %v81_v40  ;;  %368 = vmatprep.subr.mxu1 %v222_v53 }
  0x43   :  { %144 = vmatprep.subr.mxu0 %v80_v42  ;;  %369 = vmatpush3.msra.mxu1 %v206_v55 }
  0x44   :  { %145 = vmatpush1.msra.mxu0 %v79_v44  ;;  %370 = vmatprep.subr.mxu1 %v221_v56 }
  0x45   :  { %146 = vmatprep.subr.mxu0 %v78_v46  ;;  %371 = vmatpush3.msra.mxu1 %v205_v57 }
  0x46   :  { %147 = vmatpush1.msra.mxu0 %v77_v48  ;;  %372 = vmatprep.subr.mxu1 %v220_v59 }
  0x47   :  { %148 = vmatprep.subr.mxu0 %v76_v50  ;;  %373 = vmatpush3.msra.mxu1 %v204_v60 }
  0x48   :  { %149 = vmatpush1.msra.mxu0 %v75_v52  ;;  %374 = vmatprep.subr.mxu1 %v219_v61 }
  0x49   :  { %183 = vmatmul.mubr.f32.vlgmr.msra.gmra.mxu0 %v73_v54  ;;  %375 = vmatpush3.msra.mxu1 %v203_v62 }
  0x4a   :  { %188 = vmatprep.mubr.f32.mxu0 %v488_v0  ;;  %376 = vmatprep.subr.mxu1 %v218_v63  ;;  %v108_v0 = vlaneseq }
  0x4b   :  { %377 = vmatpush3.msra.mxu1 %v202_v1 }
  0x4c   :  { %378 = vmatprep.subr.mxu1 %v217_v2  ;;  %v109_v4 = vshrl.u32 %v108_v0, 7 }
  0x4d   :  { %189 = vmatmul.mubr.f32.gmra.mxu0 %v74_v58  ;;  %379 = vmatpush3.msra.mxu1 %v201_v3 }
  0x4e   :  { %v110_v5 = vsub.s32 0, %v109_v4  ;;  %v114_v7 = vsub.s32 1, %v109_v4 }
  0x50   :  { %v111_v8 = vrot.slane %v72_v6, %v110_v5  ;;  %v115_v9 = vrot.slane %v72_v6, %v114_v7 }
 0x109   :  { %v184_v10 = vpop.f32.mrf.mxu0 }
 0x10a   :  { %v185_v11 = vadd.f32 %v184_v10, %v111_v8 }
 0x10b   :  { %v186_v12 = vpop.f32.mrf.mxu0 }
 0x10c   :  { %v187_v13 = vadd.f32 %v186_v12, %v115_v9  ;;  %v195_v16 = vmax.f32 %v185_v11, 0.0 }
 0x10d   :  { %v190_v14 = vpop.f32.mrf.mxu0 }
 0x10e   :  { %v196_v15 = vmax.f32 %v187_v13, 0.0  ;;  %v191_v17 = vadd.f32 %v190_v14, %v111_v8 }
 0x10f   :  { %v192_v18 = vpop.f32.mrf.mxu0 }
 0x110   :  { %v193_v19 = vadd.f32 %v192_v18, %v115_v9  ;;  %297 = vmatprep.mubr.f32.mxu1 %v196_v15  ;;  %v197_v21 = vmax.f32 %v191_v17, 0.0 }
 0x111   :  { %298 = vmatmul.mubr.f32.vlgmr.msra.gmra.mxu1 %v195_v16 }
 0x112   :  { %v198_v20 = vmax.f32 %v193_v19, 0.0 }
 0x114   :  { %302 = vmatprep.mubr.f32.mxu1 %v198_v20 }
 0x115   :  { %303 = vmatmul.mubr.f32.gmra.mxu1 %v197_v21 }
 0x1d1   :  { %v380_v22 = vpop.f32.mrf.mxu1 }
 0x1d3   :  { %v381_v23 = vpop.f32.mrf.mxu1 }
 0x1d4   :  { %v382_v25 = vadd.f32 %v381_v23, %v380_v22 }
 0x1d5   :  { %v383_v26 = vpop.f32.mrf.mxu1 }
 0x1d6   :  { %v324_v27 = vadd.f32 %v382_v25, %v347_v24 }
 0x1d7   :  { %v384_v28 = vpop.f32.mrf.mxu1 }
 0x1d8   :  { %326 = vst [vmem:[#allocation9] sm:$0xff] %v324_v27  ;;  %v385_v29 = vadd.f32 %v384_v28, %v383_v26 }
 0x1da   :  { %v325_v30 = vadd.f32 %v385_v29, %v347_v24 }
 0x1dc   :  { %327 = vst [vmem:[#allocation9 + $0x8] sm:$0xff] %v325_v30 }
 0x1dd   :  { %466 = shalt.err (!%p463_p5)
}
 0x1de   :  { %339 = dma.vmem_to_hbm [thread:$0]  %s334_s13, 256, %s554_s5, [#allocation5], %s485_s28, %s485_s28, %s486_s29  }
 0x1df   :  { %479 = dma.done.wait [#allocation5], 256  }
 0x1e0   :  { %480 = vsyncadd [#allocation5], 4294967040 }
 0x1e1   :  { %343 = vsyncpa [#allocation4], 1 }
 0x1e2   :  { %344 = vsyncpa [#allocation7], 1 }
 0x1e3   :  { %345 = vsyncpa [#allocation5], 1 }

</bundles_post_ra>
